<compile_context>
chip_gen: v7x
topology: tpu7x:2x2x1
jax: 0.10.0
libtpu: 0.0.40
codegen_flags: <defaults>
</compile_context>

<pallas_src>
import functools

import jax
import jax.numpy as jnp
from jax.experimental import pallas as pl
from jax.experimental.pallas import tpu as pltpu


def _cdiv(a, b):
    return -(-a // b)


def _round_up(x, m):
    return ((x + m - 1) // m) * m


def _vmem_capacity_bytes():
    """Per-TensorCore VMEM capacity; conservative fallback if the query fails."""
    try:
        info = pltpu.get_tpu_info()
        cap = getattr(info, "vmem_capacity_bytes", None)
        if cap:
            return int(cap)
    except Exception:
        pass
    return 64 * 1024 * 1024  # v7x per-TC value (smallest across v5e/v6e/v7x)


# ----------------------------- kernels ---------------------------------------

def _rfb_kernel_fullk(x_ref, p_ref, phi_ref, o_ref, *, inv_nu, compute_dtype):
    # Single K step: MXU matmul + VPU/EUP epilogue (scale, bias, sin) straight
    # into the output tile. phi_ref is (1, tn) f32 and broadcasts over rows.
    a = x_ref[...].astype(compute_dtype)
    b = p_ref[...].astype(compute_dtype)
    acc = jnp.dot(a, b, preferred_element_type=jnp.float32)
    # NOTE(v7x): if the bundle ever shows VALU-bound on the sin polynomial, a
    # bf16 epilogue (when out dtype is bf16) roughly halves VALU op volume.
    o_ref[...] = jnp.sin(acc * inv_nu + phi_ref[...]).astype(o_ref.dtype)


def _rfb_kernel_ktiled_accout(x_ref, p_ref, phi_ref, o_ref, *, inv_nu,
                              compute_dtype):
    # f32 output tile is resident across the innermost ("arbitrary") k axis,
    # so accumulate directly into o_ref — no scratch accumulator needed.
    k = pl.program_id(2)

    @pl.when(k == 0)
    def _():
        o_ref[...] = jnp.zeros_like(o_ref)

    o_ref[...] += jnp.dot(x_ref[...].astype(compute_dtype),
                          p_ref[...].astype(compute_dtype),
                          preferred_element_type=jnp.float32)

    @pl.when(k == pl.num_programs(2) - 1)
    def _():
        o_ref[...] = jnp.sin(o_ref[...] * inv_nu + phi_ref[...])


def _rfb_kernel_ktiled_scratch(x_ref, p_ref, phi_ref, o_ref, acc_ref, *,
                               inv_nu, compute_dtype):
    # Non-f32 output: keep an f32 VMEM accumulator, cast only in the epilogue.
    k = pl.program_id(2)

    @pl.when(k == 0)
    def _():
        acc_ref[...] = jnp.zeros_like(acc_ref)

    acc_ref[...] += jnp.dot(x_ref[...].astype(compute_dtype),
                            p_ref[...].astype(compute_dtype),
                            preferred_element_type=jnp.float32)

    @pl.when(k == pl.num_programs(2) - 1)
    def _():
        o_ref[...] = jnp.sin(acc_ref[...] * inv_nu + phi_ref[...]).astype(o_ref.dtype)


# ----------------------------- wrapper ----------------------------------------

def random_fourier_basis(x, P, phi, nu, *, tm=None, tn=None, tk=None,
                         compute_dtype=jnp.float32, out_dtype=jnp.float32,
                         vmem_budget_bytes=None):
    """sin(x @ P / nu + phi) as a Pallas TPU kernel.

    x:   [M, K] float32
    P:   [K, N] float32
    phi: [N]    float32
    compute_dtype: dtype the MXU runs at (float32 or bfloat16); accumulation and
                   the sin epilogue are always float32.
    out_dtype: output dtype (float32 default; bfloat16 halves output HBM traffic).
    """
    M, K = x.shape
    K2, N = P.shape
    assert K == K2 and phi.shape == (N,), "shape mismatch"

    compute_dtype = jnp.dtype(compute_dtype)
    out_dtype = jnp.dtype(out_dtype)
    x_bytes = x.dtype.itemsize
    out_bytes = out_dtype.itemsize

    # bf16 packs two rows per sublane -> keep row tiles multiples of 16 then.
    sub = 16 if (compute_dtype == jnp.dtype(jnp.bfloat16)
                 or out_dtype == jnp.dtype(jnp.bfloat16)) else 8

    # ---- VMEM budget / limit, clamped to this chip's per-core capacity ------
    cap = _vmem_capacity_bytes()
    if vmem_budget_bytes is None:
        vmem_budget_bytes = int(0.70 * cap)          # ~88 MiB v5e/v6e, ~44 MiB v7x
    vmem_budget_bytes = min(int(vmem_budget_bytes), int(0.80 * cap))
    vmem_limit = int(min(0.90 * cap, max(32 << 20, vmem_budget_bytes + (8 << 20))))

    # ---- tile selection (lane-dense, rebalanced to bound padding waste) -----
    tm_max = 512 if tm is None else max(sub, _round_up(int(tm), sub))
    tn_max = 1024 if tn is None else max(128, _round_up(int(tn), 128))

    gi = _cdiv(M, tm_max)
    tm = _round_up(_cdiv(M, gi), sub)
    gj = _cdiv(N, tn_max)
    tn = _round_up(_cdiv(N, gj), 128)

    # K handling: full-K slab by default; explicit (or budget-forced) K tiling.
    if tk is not None and int(tk) < K:
        tk_eff = max(128, (int(tk) // 128) * 128)
        if tk_eff >= K:
            tk_eff = K
    else:
        tk_eff = K

    def footprint(tm_, tn_, tk_):
        ktiled = tk_ < K
        fp = 2 * tm_ * tk_ * x_bytes        # x tile, double-buffered
        fp += 2 * tk_ * tn_ * 4             # P tile (conservatively f32 stream)
        fp += 2 * tn_ * 4                   # phi tile
        fp += 2 * tm_ * tn_ * out_bytes     # output tile
        if ktiled and out_bytes != 4:
            fp += tm_ * tn_ * 4             # f32 accumulator scratch
        return fp

    def fits():
        return footprint(tm, tn, tk_eff) <= vmem_budget_bytes

    # Prefer K-tiling over shrinking tm/tn: large tm minimizes P re-streams,
    # large tn keeps output stores lane-dense.
    if not fits() and tk_eff == K and K > 1024:
        tk_eff = 512
    while not fits() and tn > 128:
        h = tn // 2
        tn = (h // 256) * 256 if h >= 256 else 128   # keep 256-lane MXU width
    while not fits() and tm > sub:
        tm = max(sub, ((tm // 2) // sub) * sub)
    while not fits() and K > tk_eff > 128:
        tk_eff = max(128, ((tk_eff // 2) // 128) * 128)

    gi = _cdiv(M, tm)
    gj = _cdiv(N, tn)
    gk = _cdiv(K, tk_eff) if tk_eff < K else 1

    # ---- megacore (v7x: 2 TCs/chip): parallel step count >= 2, avoid tiny odd
    # counts that leave one TensorCore idle for up to half the kernel.
    tries = 0
    while tries < 3 and (gi * gj < 2 or (gi * gj < 4 and (gi * gj) % 2 == 1)):
        if tn >= 256:
            tn = _round_up(_cdiv(N, 2 * gj), 128)
            gj = _cdiv(N, tn)
        elif tm >= 2 * sub:
            tm = _round_up(_cdiv(M, 2 * gi), sub)
            gi = _cdiv(M, tm)
        else:
            break
        tries += 1

    # ---- grid order: minimize re-streamed operand HBM traffic ---------------
    if gk == 1:
        # j innermost -> P re-read gi times, x read once.
        # i innermost -> x re-read gj times, P read once.
        j_inner = gi * K * N <= gj * M * K
        p_restreams = gi if j_inner else 1
    else:
        j_inner = True
        p_restreams = gi

    # ---- operand prep: NO M/N padding (partial edge blocks are masked). -----
    x_in = x          # x is streamed exactly once -> never pre-cast in wrapper
    p_in = P
    if compute_dtype.itemsize < P.dtype.itemsize and p_restreams >= 4:
        # Pre-cast P only when it is re-streamed enough to amortize the extra
        # read-f32/write-bf16 wrapper pass.
        p_in = P.astype(compute_dtype)

    if gk > 1:
        K_pad = gk * tk_eff
        if K_pad != K:
            # zero-pad along K only: OOB K data would corrupt the matmul,
            # whereas OOB M/N blocks are simply discarded on store.
            x_in = jnp.pad(x_in, ((0, 0), (0, K_pad - K)))
            p_in = jnp.pad(p_in, ((0, K_pad - K), (0, 0)))
    else:
        K_pad = K

    phi2d = phi.astype(jnp.float32).reshape(1, N)
    inv_nu = float(1.0 / nu)

    # ---- grid / specs --------------------------------------------------------
    if gk == 1:
        kernel = functools.partial(_rfb_kernel_fullk, inv_nu=inv_nu,
                                   compute_dtype=compute_dtype)
        if j_inner:
            grid = (gi, gj)
            x_spec = pl.BlockSpec((tm, K_pad), lambda i, j: (i, 0))
            p_spec = pl.BlockSpec((K_pad, tn), lambda i, j: (0, j))
            phi_spec = pl.BlockSpec((1, tn), lambda i, j: (0, j))
            o_spec = pl.BlockSpec((tm, tn), lambda i, j: (i, j))
        else:
            grid = (gj, gi)
            x_spec = pl.BlockSpec((tm, K_pad), lambda j, i: (i, 0))
            p_spec = pl.BlockSpec((K_pad, tn), lambda j, i: (0, j))
            phi_spec = pl.BlockSpec((1, tn), lambda j, i: (0, j))
            o_spec = pl.BlockSpec((tm, tn), lambda j, i: (i, j))
        scratch = []
        dim_sem = ("parallel", "parallel")
    else:
        if out_bytes == 4:
            kernel = functools.partial(_rfb_kernel_ktiled_accout, inv_nu=inv_nu,
                                       compute_dtype=compute_dtype)
            scratch = []
        else:
            kernel = functools.partial(_rfb_kernel_ktiled_scratch, inv_nu=inv_nu,
                                       compute_dtype=compute_dtype)
            scratch = [pltpu.VMEM((tm, tn), jnp.float32)]
        grid = (gi, gj, gk)
        x_spec = pl.BlockSpec((tm, tk_eff), lambda i, j, k: (i, k))
        p_spec = pl.BlockSpec((tk_eff, tn), lambda i, j, k: (k, j))
        phi_spec = pl.BlockSpec((1, tn), lambda i, j, k: (0, j))
        o_spec = pl.BlockSpec((tm, tn), lambda i, j, k: (i, j))
        dim_sem = ("parallel", "parallel", "arbitrary")

    return pl.pallas_call(
        kernel,
        out_shape=jax.ShapeDtypeStruct((M, N), out_dtype),
        grid_spec=pltpu.PrefetchScalarGridSpec(
            num_scalar_prefetch=0,
            grid=grid,
            in_specs=[x_spec, p_spec, phi_spec],
            out_specs=o_spec,
            scratch_shapes=scratch,
        ),
        compiler_params=pltpu.CompilerParams(
            dimension_semantics=dim_sem,
            vmem_limit_bytes=vmem_limit,
        ),
    )(x_in, p_in, phi2d)


if __name__ == "__main__":
    key = jax.random.PRNGKey(0)
    nu = 4.0

    def make_inputs(k, batch, input_size, n_output):
        kx, kP, kphi = jax.random.split(k, 3)
        x = jax.random.normal(kx, (batch, input_size), dtype=jnp.float32)
        P = jax.random.normal(kP, (input_size, n_output), dtype=jnp.float32)
        phi = jax.random.uniform(kphi, (n_output,), dtype=jnp.float32,
                                 minval=-jnp.pi, maxval=jnp.pi)
        return x, P, phi

    # 1) Baseline small shape (batch=8, input=16, n_output=128), f32 path.
    x, P, phi = make_inputs(key, 8, 16, 128)
    out = jax.block_until_ready(random_fourier_basis(x, P, phi, nu))
    ref = jnp.sin(x @ P / nu + phi)
    assert out.shape == ref.shape and out.dtype == jnp.float32
    assert jnp.allclose(out, ref, atol=1e-4, rtol=1e-4), "mismatch (f32 path)"

    # 2) Non-multiple shape -> exercises masked partial edge blocks (no pads).
    x2, P2, phi2 = make_inputs(jax.random.fold_in(key, 1), 10, 5, 100)
    out2 = jax.block_until_ready(random_fourier_basis(x2, P2, phi2, nu))
    ref2 = jnp.sin(x2 @ P2 / nu + phi2)
    assert out2.shape == ref2.shape
    assert jnp.allclose(out2, ref2, atol=1e-4, rtol=1e-4), "mismatch (edge-block path)"

    # 3) K-tiled accumulate-into-output path + bf16 MXU (f32 accumulate).
    x3, P3, phi3 = make_inputs(jax.random.fold_in(key, 2), 16, 256, 256)
    out3 = jax.block_until_ready(
        random_fourier_basis(x3, P3, phi3, nu, tk=128,
                             compute_dtype=jnp.bfloat16))
    ref3 = jnp.sin(
        jnp.dot(x3, P3, precision=jax.lax.Precision.HIGHEST) / nu + phi3)
    assert out3.shape == ref3.shape
    assert jnp.allclose(out3, ref3, atol=1.5e-1, rtol=0.0), "mismatch (bf16/K-tiled)"

    # 4) bf16 output option (halved output HBM stream), f32 compute.
    out4 = jax.block_until_ready(
        random_fourier_basis(x, P, phi, nu, out_dtype=jnp.bfloat16))
    assert out4.dtype == jnp.bfloat16 and out4.shape == ref.shape
    assert jnp.allclose(out4.astype(jnp.float32), ref, atol=2e-2,
                        rtol=0.0), "mismatch (bf16 output)"

    print("KERNEL_OK")
</pallas_src>

<mosaic_0001>
module attributes {stable_mosaic.version = 11 : i64} {
  func.func @_rfb_kernel_fullk(%arg0: i32, %arg1: i32, %arg2: memref<8x16xf32, #tpu.memory_space<vmem>>, %arg3: memref<16x128xf32, #tpu.memory_space<vmem>>, %arg4: memref<1x128xf32, #tpu.memory_space<vmem>>, %arg5: memref<8x128xf32, #tpu.memory_space<vmem>>) attributes {dimension_semantics = [#tpu.dimension_semantics<parallel>, #tpu.dimension_semantics<parallel>], iteration_bounds = array<i64: 1, 1>, scalar_prefetch = 0 : i64, scratch_operands = 0 : i64, tpu.core_type = #tpu.core_type<tc>, window_params = [{transform_indices = @transform_0, window_bounds = array<i64: 8, 16>}, {transform_indices = @transform_1, window_bounds = array<i64: 16, 128>}, {transform_indices = @transform_2, window_bounds = array<i64: 1, 128>}, {transform_indices = @transform_3, window_bounds = array<i64: 8, 128>}]} {
    %c0 = arith.constant 0 : index
    %c0_0 = arith.constant 0 : index
    %0 = vector.load %arg2[%c0, %c0_0] : memref<8x16xf32, #tpu.memory_space<vmem>>, vector<8x16xf32>
    %c0_1 = arith.constant 0 : index
    %c0_2 = arith.constant 0 : index
    %1 = vector.load %arg3[%c0_1, %c0_2] : memref<16x128xf32, #tpu.memory_space<vmem>>, vector<16x128xf32>
    %cst = arith.constant dense<0.000000e+00> : vector<8x128xf32>
    %2 = tpu.matmul %0, %1, %cst {dimension_numbers = #tpu.dot_dimension_numbers<[1], [0], [0], [1], [0, 0, 1, 1], [], []>} : vector<8x16xf32>, vector<16x128xf32>, vector<8x128xf32> -> vector<8x128xf32>
    %cst_3 = arith.constant 2.500000e-01 : f32
    %3 = vector.broadcast %cst_3 : f32 to vector<8x128xf32>
    %4 = arith.mulf %2, %3 : vector<8x128xf32>
    %c0_4 = arith.constant 0 : index
    %c0_5 = arith.constant 0 : index
    %5 = vector.load %arg4[%c0_4, %c0_5] : memref<1x128xf32, #tpu.memory_space<vmem>>, vector<1x128xf32>
    %6 = vector.broadcast %5 : vector<1x128xf32> to vector<8x128xf32>
    %7 = arith.addf %4, %6 : vector<8x128xf32>
    %8 = math.sin %7 : vector<8x128xf32>
    %c0_6 = arith.constant 0 : index
    %c0_7 = arith.constant 0 : index
    %9 = vector.load %arg5[%c0_6, %c0_7] : memref<8x128xf32, #tpu.memory_space<vmem>>, vector<8x128xf32>
    tpu.vector_store %arg5[%c0_6, %c0_7], %8 {strides = array<i32>} : memref<8x128xf32, #tpu.memory_space<vmem>>, vector<8x128xf32>,
    return
  }
  func.func @transform_0(%arg0: i32, %arg1: i32) -> (i32, i32) {
    %c0_i32 = arith.constant 0 : i32
    %c0_i32_0 = arith.constant 0 : i32
    return %arg1, %c0_i32 : i32, i32
  }
  func.func @transform_1(%arg0: i32, %arg1: i32) -> (i32, i32) {
    %c0_i32 = arith.constant 0 : i32
    %c0_i32_0 = arith.constant 0 : i32
    return %c0_i32, %arg0 : i32, i32
  }
  func.func @transform_2(%arg0: i32, %arg1: i32) -> (i32, i32) {
    %c0_i32 = arith.constant 0 : i32
    %c0_i32_0 = arith.constant 0 : i32
    return %c0_i32, %arg0 : i32, i32
  }
  func.func @transform_3(%arg0: i32, %arg1: i32) -> (i32, i32) {
    %c0_i32 = arith.constant 0 : i32
    return %arg1, %arg0 : i32, i32
  }
}

</mosaic_0001>

<bundles_post_ra>
// kernel: tpu_custom_call.1
= control target key start
LH: loop header
LB: loop body
LE: loop exit
PB: predicated region body
PF: predicated region fallthrough
CT: control target
= control target key end

     0   :  { %8 = vsyncpa [#allocation3], 0  ;;  %s462_s0 = inlined_call_operand.hbm [shape: f32[8,16], index: 0, kind: input, shape index: {}]   ;;  %s463_s1 = inlined_call_operand.hbm [shape: f32[16,128], index: 1, kind: input, shape index: {}]   ;;  %s464_s2 = inlined_call_operand.vmem [shape: f32[1,128], index: 2, kind: input, shape index: {}]   ;;  %s465_s3 = inlined_call_operand.hbm [shape: f32[8,128], index: 3, kind: output, shape index: {}]  }
   0x1   :  { %9 = vsyncpa [#allocation6], 0 }
   0x2   :  { %10 = vsyncpa [#allocation4], 0  ;;  %s361_s12 = smov [#allocation2]   ;;  %s362_s14 = smov [#allocation5]  }
   0x3   :  { %s17_s13 = sshll.u32 %s361_s12, 4  ;;  %s26_s15 = sshll.u32 %s362_s14, 4  ;;  %s18_s13 = int_to_ptr.vmem [resolvable:$true] %s17_s13  ;;  %s395_s15 = int_to_ptr.vmem [resolvable:$true] %s26_s15 }
   0x4   :  { %s289_s18 = scalar_lea.hbm %s462_s0, 128 }
   0x5   :  { %p290_p0 = scmp.ne.s32.totalorder %s462_s0, %s289_s18  ;;  %p293_p1 = scmp.lt.u32.totalorder %s289_s18, %s462_s0 }
   0x7   :  { %p295_p2 = pnand %p293_p1, %p290_p0 }
   0x9   :  { %298 = shalt.err (!%p295_p2)
}
   0xa   :  { %s299_s23 = scalar_lea.vmem %s18_s13, 128  ;;  %p304_p4 = scmp.lt.s32.totalorder %s18_s13, %s18_s13 }
   0xb   :  { %p300_p3 = scmp.ne.s32.totalorder %s18_s13, %s299_s23  ;;  %p305_p5 = scmp.lt.s32.totalorder %s299_s23, %s299_s23 }
   0xd   :  { %p306_p6 = por %p305_p5, %p304_p4 }
   0xf   :  { %p307_p7 = pnand %p306_p6, %p300_p3 }
  0x11   :  { %310 = shalt.err (!%p307_p7)
}
  0x12   :  { %20 = dma.hbm_to_vmem [thread:$0]  %s462_s0, 128, %s18_s13, [#allocation3]  }
  0x13   :  { %s311_s28 = scalar_lea.hbm %s463_s1, 256 }
  0x14   :  { %p312_p8 = scmp.ne.s32.totalorder %s463_s1, %s311_s28  ;;  %p315_p9 = scmp.lt.u32.totalorder %s311_s28, %s463_s1 }
  0x16   :  { %p317_p10 = pnand %p315_p9, %p312_p8 }
  0x18   :  { %320 = shalt.err (!%p317_p10)
}
  0x19   :  { %s321_s6 = scalar_lea.vmem %s395_s15, 256  ;;  %p326_p12 = scmp.lt.s32.totalorder %s395_s15, %s395_s15 }
  0x1a   :  { %p322_p11 = scmp.ne.s32.totalorder %s395_s15, %s321_s6  ;;  %p327_p13 = scmp.lt.s32.totalorder %s321_s6, %s321_s6 }
  0x1c   :  { %p328_p0 = por %p327_p13, %p326_p12 }
  0x1e   :  { %p329_p1 = pnand %p328_p0, %p322_p11 }
  0x20   :  { %332 = shalt.err (!%p329_p1)
}
  0x21   :  { %s363_s0 = smov 128   ;;  %s364_s7 = smov 8  }
  0x22   :  { %32 = dma.hbm_to_vmem [thread:$0]  %s463_s1, 256, %s395_s15, [#allocation6], %s363_s0, %s363_s0, %s364_s7  }
  0x23   :  { %355 = dma.done.wait [#allocation3], 128  }
  0x24   :  { %356 = vsyncadd [#allocation3], 4294967168 }
  0x25   :  { %357 = dma.done.wait [#allocation6], 256  }
  0x26   :  { %358 = vsyncadd [#allocation6], 4294967040  ;;  %v365_v0 = vmov 0.0|0.0   ;;  %vm366_vm0 = vmmov 0   ;;  %v367_v1 = vmov 0.0   ;;  %v42_v2 = vld [vmem:[#allocation5] sm:$0xff] }
  0x27   :  { %264 = vmatprep.subr.bf16.mxu0 %v365_v0  ;;  %261 = vmatprep.mubr.msk.f32.mxu0 %vm366_vm0, %v367_v1  ;;  %v43_v3 = vld [vmem:[#allocation5 + $0x8] sm:$0xff]  ;;  %v41_v5 = vld [vmem:[#allocation2] sm:$0xff]  ;;  %vm44_vm1 = vcmask 130048   ;;  %v368_v22 = vmov 2102212464   ;;  %s374_s1 = smov [#allocation7]  }
  0x28   :  { %v265_v4 = vpack.c.bf16 %v43_v3, %v42_v2  ;;  %v249_v7 = vld [vmem:[%s464_s2] ss:$0 sm:$0xff]  ;;  %v369_v24 = vmov 920167782   ;;  %v370_v28 = vmov 1326507024  }
  0x29   :  { %v371_v30 = vmov 683565275   ;;  %v372_v32 = vmov 2475754826   ;;  %v373_v35 = vmov 2131351028  }
  0x2a   :  { %266 = vmatpush3.bf16.msra.mxu0 %v265_v4  ;;  %s238_s2 = sshll.u32 %s374_s1, 4  ;;  %s239_s2 = int_to_ptr.vmem [resolvable:$true] %s238_s2 }
  0x2b   :  { %s333_s12 = scalar_lea.vmem %s239_s2, 128  ;;  %p338_p3 = scmp.lt.s32.totalorder %s239_s2, %s239_s2 }
  0x2c   :  { %p334_p2 = scmp.ne.s32.totalorder %s239_s2, %s333_s12  ;;  %p339_p4 = scmp.lt.s32.totalorder %s333_s12, %s333_s12 }
  0x2d   :  { %262 = vmatmul.mubr.msk.f32.vlgmr.msra.gmra.mrb[0].mxu0 %vm44_vm1, %v41_v5 }
  0x2e   :  { %p340_p5 = por %p339_p4, %p338_p3 }
  0x30   :  { %p341_p6 = pnand %p340_p5, %p334_p2 }
 0x100   :  { %v114_v6 = vpop.f32.mrb[0].mxu0 }
 0x101   :  { %v118_v8 = vmul.f32 0.25, %v114_v6  ;;  %v263_v9 = vpop.f32.mrb[1].mxu0 }
 0x103   :  { %v429_v10 = vadd.f32 %v249_v7, %v118_v8 }
 0x105   :  { %v130_v11 = vand.u32 2139095040, %v429_v10  ;;  %v127_v12 = vand.u32 2147483647, %v429_v10  ;;  %vm129_vm9 = vcmp.lt.s32.totalorder %v429_v10, 0  ;;  %vm219_vm14 = vweird.f32 %v429_v10 }
 0x107   :  { %v131_v13 = vshrl.u32 %v130_v11, 23  ;;  %v134_v15 = vand.u32 8388607, %v127_v12  ;;  %vm128_vm10 = vcmp.le.f32.partialorder %v127_v12, 0.7853982 }
 0x109   :  { %v250_v14 = vadd.s32 4294967169, %v131_v13  ;;  %v135_v18 = vor.u32 8388608, %v134_v15 }
 0x10b   :  { %v137_v16 = vadd.s32 1, %v250_v14  ;;  %v175_v26 = vshll.u32 %v135_v18, 8 }
 0x10d   :  { %vm138_vm2 = vcmp.gt.s32.totalorder %v137_v16, 0 }
 0x10e   :  { %v139_v17 = vsel %vm138_vm2, %v137_v16, 0 }
 0x10f   :  { %v141_v19 = vand.u32 31, %v139_v17  ;;  %v140_v20 = vshrl.u32 %v139_v17, 5 }
 0x111   :  { %v142_v21 = vsub.s32 32, %v141_v19  ;;  %v153_v23 = vshll.u32 %v368_v22, %v141_v19  ;;  %v156_v25 = vshll.u32 %v369_v24, %v141_v19  ;;  %v144_v31 = vshll.u32 %v371_v30, %v141_v19 }
 0x112   :  { %v147_v34 = vshll.u32 %v372_v32, %v141_v19  ;;  %v150_v37 = vshll.u32 %v373_v35, %v141_v19  ;;  %vm162_vm3 = vcmp.lt.s32.totalorder %v140_v20, 4  ;;  %vm159_vm4 = vcmp.lt.s32.totalorder %v140_v20, 1 }
 0x113   :  { %v154_v27 = vshrl.u32 %v369_v24, %v142_v21  ;;  %v157_v29 = vshrl.u32 %v370_v28, %v142_v21  ;;  %v145_v33 = vshrl.u32 %v372_v32, %v142_v21  ;;  %v148_v36 = vshrl.u32 %v373_v35, %v142_v21 }
 0x114   :  { %v151_v38 = vshrl.u32 %v368_v22, %v142_v21  ;;  %v143_v42 = vshrl.u32 %v371_v30, %v142_v21  ;;  %vm160_vm5 = vcmp.lt.s32.totalorder %v140_v20, 2  ;;  %vm161_vm6 = vcmp.lt.s32.totalorder %v140_v20, 3 }
 0x115   :  { %v155_v39 = vor.u32 %v154_v27, %v153_v23  ;;  %v158_v40 = vor.u32 %v157_v29, %v156_v25  ;;  %v146_v41 = vor.u32 %v145_v33, %v144_v31  ;;  %v149_v43 = vor.u32 %v148_v36, %v147_v34 }
 0x116   :  { %v152_v44 = vor.u32 %v151_v38, %v150_v37 }
 0x117   :  { %v168_v45 = vsel %vm162_vm3, %v155_v39, 920167782  ;;  %v172_v46 = vsel %vm162_vm3, %v158_v40, 1326507024  ;;  %v167_v48 = vsel %vm159_vm4, %v146_v41, %v149_v43  ;;  %v163_v51 = vsel %vm159_vm4, %v143_v42, %v146_v41 }
 0x118   :  { %v164_v47 = vsel %vm162_vm3, %v152_v44, 2102212464  ;;  %v169_v49 = vsel %vm161_vm6, %v152_v44, %v168_v45  ;;  %v171_v50 = vsel %vm159_vm4, %v149_v43, %v152_v44  ;;  %v173_v54 = vsel %vm161_vm6, %v155_v39, %v172_v46 }
 0x119   :  { %v165_v52 = vsel %vm161_vm6, %v149_v43, %v164_v47  ;;  %v170_v53 = vsel %vm160_vm5, %v167_v48, %v169_v49  ;;  %v174_v55 = vsel %vm160_vm5, %v171_v50, %v173_v54 }
 0x11a   :  { %v435_v56 = vmul.u32.u64.low %v175_v26, %v170_v53  ;;  %v436_v57 = vmul.u32.u64.high %v175_v26, %v170_v53, %v435_v56  ;;  %v438_v58 = vmul.u32.u64.low %v175_v26, %v174_v55  ;;  %v439_v59 = vmul.u32.u64.high %v175_v26, %v174_v55, %v438_v58 }
 0x11b   :  { %v166_v60 = vsel %vm160_vm5, %v163_v51, %v165_v52 }
 0x11c   :  { %v185_v61 = vadd.s32 1, %v436_v57  ;;  %v182_v62 = vmul.u32 %v175_v26, %v166_v60  ;;  %vm184_vm7 = vc.u32 %v439_v59, %v435_v56  ;;  %v183_v11 = vadd.s32 %v435_v56, %v439_v59 }
 0x11e   :  { %v186_v63 = vsel %vm184_vm7, %v185_v61, %v436_v57 }
 0x11f   :  { %v187_v0 = vadd.s32 %v186_v63, %v182_v62 }
 0x121   :  { %v188_v1 = vadd.s32 536870912, %v187_v0 }
 0x123   :  { %v189_v2 = vshrl.u32 %v188_v1, 30 }
 0x125   :  { %v190_v3 = vshll.u32 %v189_v2, 30  ;;  %v213_v24 = vsub.s32 4, %v189_v2 }
 0x127   :  { %v191_v4 = vsub.s32 %v187_v0, %v190_v3  ;;  %v214_v27 = vsel %vm129_vm9, %v213_v24, %v189_v2 }
 0x128   :  { %v216_v29 = vsel %vm128_vm10, 0, %v214_v27 }
 0x129   :  { %v193_v5 = vsub.s32 0, %v191_v4  ;;  %v220_v30 = vadd.s32 3, %v216_v29 }
 0x12b   :  { %v251_v6 = vmin.u32 %v193_v5, %v191_v4  ;;  %v221_v31 = vand.u32 3, %v220_v30 }
 0x12d   :  { %v195_v7 = vclz %v251_v6  ;;  %vm226_vm11 = vcmp.eq.s32.totalorder %v221_v31, 2  ;;  %vm223_vm12 = vcmp.eq.s32.totalorder %v221_v31, 0  ;;  %vm222_vm13 = vcmp.lt.s32.totalorder %v221_v31, 2 }
 0x12f   :  { %v252_v8 = vadd.s32 4294967294, %v195_v7 }
 0x131   :  { %vm253_vm8 = vcmp.lt.s32.totalorder %v252_v8, 0 }
 0x132   :  { %v198_v9 = vsel %vm253_vm8, 0, %v252_v8 }
 0x133   :  { %v199_v13 = vsub.s32 32, %v198_v9  ;;  %v203_v14 = vsub.s32 4294967266, %v198_v9  ;;  %v200_v15 = vshll.u32 %v191_v4, %v198_v9 }
 0x135   :  { %v201_v16 = vshrl.u32 %v183_v11, %v199_v13  ;;  %v204_v17 = vadd.s32 127, %v203_v14 }
 0x137   :  { %v202_v18 = vor.u32 %v201_v16, %v200_v15  ;;  %v205_v19 = vshll.u32 %v204_v17, 23 }
 0x139   :  { %v206_v20 = vor.u32 4788187, %v205_v19  ;;  %v209_v22 = vcvt.s32.f32 %v202_v18 }
 0x13b   :  { %v207_v21 = vand.u32 2147483647, %v206_v20 }
 0x13d   :  { %v210_v23 = vmul.f32 %v209_v22, %v207_v21 }
 0x13f   :  { %v211_v25 = vxor.u32 2147483648, %v210_v23 }
 0x141   :  { %v212_v26 = vsel %vm129_vm9, %v211_v25, %v210_v23 }
 0x142   :  { %v215_v28 = vsel %vm128_vm10, %v429_v10, %v212_v26 }
 0x143   :  { %285 = vcosq.f32 %v215_v28 }
 0x144   :  { %287 = vsinq.f32 %v215_v28 }
 0x14d   :  { %v286_v32 = vpop.eup %285 }
 0x14e   :  { %v288_v33 = vpop.eup %287  ;;  %v227_v34 = vxor.u32 2147483648, %v286_v32 }
 0x14f   :  { %v224_v35 = vxor.u32 2147483648, %v288_v33 }
 0x150   :  { %v228_v36 = vsel %vm226_vm11, %v227_v34, %v288_v33 }
 0x151   :  { %v225_v12 = vsel %vm223_vm12, %v286_v32, %v224_v35 }
 0x152   :  { %v229_v37 = vsel %vm222_vm13, %v225_v12, %v228_v36 }
 0x153   :  { %v230_v38 = vsel %vm219_vm14, nan, %v229_v37 }
 0x154   :  { %231 = vst [vmem:[#allocation7] sm:$0xff] %v230_v38 }
 0x155   :  { %344 = shalt.err (!%p341_p6)
}
 0x156   :  { %s345_s15 = scalar_lea.hbm %s465_s3, 128 }
 0x157   :  { %p346_p7 = scmp.ne.s32.totalorder %s465_s3, %s345_s15  ;;  %p349_p8 = scmp.lt.u32.totalorder %s345_s15, %s465_s3 }
 0x159   :  { %p351_p9 = pnand %p349_p8, %p346_p7 }
 0x15b   :  { %354 = shalt.err (!%p351_p9)
}
 0x15c   :  { %241 = dma.vmem_to_hbm [thread:$0]  %s239_s2, 128, %s465_s3, [#allocation4]  }
 0x15d   :  { %359 = dma.done.wait [#allocation4], 128  }
 0x15e   :  { %360 = vsyncadd [#allocation4], 4294967168 }
 0x15f   :  { %245 = vsyncpa [#allocation3], 1 }
 0x160   :  { %246 = vsyncpa [#allocation6], 1 }
 0x161   :  { %247 = vsyncpa [#allocation4], 1 }

</bundles_post_ra>
